<compile_context>
chip_gen: v7x
topology: tpu7x:2x2x1
jax: 0.10.0
libtpu: 0.0.40
codegen_flags: <defaults>
</compile_context>

<pallas_src>
import functools

import jax
import jax.numpy as jnp
from jax.experimental import pallas as pl
from jax.experimental.pallas import tpu as pltpu


_MXU_MIN_K = 8  # feature pieces narrower than this use a VPU MAC, not the MXU


# ----------------------------- Pallas kernel ------------------------------- #
def _fused_shop_mlp_kernel(feature_dims, num_layers, compute_dtype, *refs):
    """Fused:  ReLU(... ReLU(concat(features) @ W0 + b0) ... @ W_{L-1} + b_{L-1}).

    refs = (*feature_refs,            # nf arrays, each (bm, d_k) float32
            *w0_piece_refs,           # nf arrays, W0 split along rows
            b0_ref,                   # (1, N0) float32
            w1, b1, ..., w_{L-1}, b_{L-1},
            o_ref)                    # (bm, N_out) float32, unpadded lanes
    Hidden activations live in vregs/VMEM only — never written to HBM.
    """
    nf = len(feature_dims)
    feat_refs = refs[:nf]
    w0_refs = refs[nf:2 * nf]
    b0_ref = refs[2 * nf]
    layer_refs = refs[2 * nf + 1:-1]
    o_ref = refs[-1]

    # ---- layer 0: concat(features) @ W0 as a split matmul (no concat ever) --
    acc = None
    for k, dk in enumerate(feature_dims):
        x = feat_refs[k][...]                       # (bm, dk) f32 from HBM
        w = w0_refs[k][...]                         # (dk, N0)
        if dk < _MXU_MIN_K:
            # Narrow piece: f32 broadcast multiply-accumulate on the VPU.
            w = w.astype(jnp.float32)
            term = x[:, 0:1] * w[0:1, :]
            for j in range(1, dk):
                term = term + x[:, j:j + 1] * w[j:j + 1, :]
        else:
            # Wide piece: MXU dot, bf16 (or f32) operands, f32 accumulate.
            term = jnp.dot(x.astype(compute_dtype), w,
                           preferred_element_type=jnp.float32)
        acc = term if acc is None else acc + term
    h = jnp.maximum(acc + b0_ref[...], 0.0)         # f32 bias + ReLU (VPU)

    # ---- layers 1 .. L-1 ----------------------------------------------------
    for l in range(num_layers - 1):
        w = layer_refs[2 * l][...]
        b = layer_refs[2 * l + 1][...]
        y = jnp.dot(h.astype(compute_dtype), w,
                    preferred_element_type=jnp.float32) + b
        h = jnp.maximum(y, 0.0)

    o_ref[...] = h.astype(o_ref.dtype)


# ------------------------------ host wrapper ------------------------------- #
def fused_shop_mlp(features, params, *, compute_dtype=jnp.bfloat16, bm=None,
                   out_dtype=jnp.float32):
    """features: list of (M, d_k) float32 arrays (concatenated logically along
    the last dim); params: [(W_l (K_l, N_l), b_l (N_l,)), ...] with
    K_0 == sum(d_k).  Returns ReLU-MLP output of shape (M, N_out)."""
    feature_dims = tuple(int(f.shape[-1]) for f in features)
    M = int(features[0].shape[0])
    num_layers = len(params)
    n_out = int(params[-1][0].shape[1])
    assert int(params[0][0].shape[0]) == sum(feature_dims)

    # Row tile: big (fewer ~0.35us grid steps, bigger DMAs), but capped so the
    # grid has >= 2 tiles when there is enough work — v7x has 2 TensorCores
    # and the "parallel" row axis shards across them.  Multiple of 8 (f32
    # sublane) is enough since all HBM-facing blocks are f32.
    if bm is None:
        bm = 2048
    half = max(8, pl.cdiv(pl.cdiv(M, 2), 8) * 8)
    bm = max(8, min(bm, half))
    grid = (pl.cdiv(M, bm),)   # no wrapper-side pad; Pallas masks the ragged tail

    flat_args = []
    in_specs = []

    # Row-blocked feature pieces, read as f32 straight from HBM.
    for f, dk in zip(features, feature_dims):
        flat_args.append(f)
        in_specs.append(pl.BlockSpec((bm, dk), lambda i: (i, 0)))

    # Layer-0 weight split along rows to match the feature pieces; every
    # weight/bias is whole-resident in VMEM (constant index_map).
    w0, b0 = params[0]
    off = 0
    for dk in feature_dims:
        piece = w0[off:off + dk, :]
        off += dk
        piece = piece.astype(jnp.float32 if dk < _MXU_MIN_K else compute_dtype)
        flat_args.append(piece)
        in_specs.append(pl.BlockSpec(piece.shape, lambda i: (0, 0)))
    b0_2d = b0.astype(jnp.float32).reshape(1, -1)
    flat_args.append(b0_2d)
    in_specs.append(pl.BlockSpec(b0_2d.shape, lambda i: (0, 0)))

    for w, b in params[1:]:
        w = w.astype(compute_dtype)
        b = b.astype(jnp.float32).reshape(1, -1)
        flat_args += [w, b]
        in_specs += [pl.BlockSpec(w.shape, lambda i: (0, 0)),
                     pl.BlockSpec(b.shape, lambda i: (0, 0))]

    return pl.pallas_call(
        functools.partial(_fused_shop_mlp_kernel, feature_dims, num_layers,
                          compute_dtype),
        out_shape=jax.ShapeDtypeStruct((M, n_out), out_dtype),
        grid_spec=pltpu.PrefetchScalarGridSpec(
            num_scalar_prefetch=0,
            grid=grid,
            in_specs=in_specs,
            # Unpadded output block: last dim == full array dim (legal spec);
            # masked vst accepted — far cheaper than 4x padded f32 HBM writes.
            out_specs=pl.BlockSpec((bm, n_out), lambda i: (i, 0)),
        ),
        compiler_params=pltpu.CompilerParams(
            dimension_semantics=("parallel",),   # shard row tiles across TCs (v7x)
        ),
    )(*flat_args)


# ------------------------------ Module port -------------------------------- #
def init_shop_mlp_params(key, layer_sizes):
    """Deterministic init matching torch.nn.Linear shapes: W (in, out), b (out,)."""
    params = []
    for in_size, out_size in zip(layer_sizes[:-1], layer_sizes[1:]):
        key, kw, kb = jax.random.split(key, 3)
        bound = 1.0 / jnp.sqrt(jnp.float32(in_size))
        w = jax.random.uniform(kw, (in_size, out_size), jnp.float32, -bound, bound)
        b = jax.random.uniform(kb, (out_size,), jnp.float32, -bound, bound)
        params.append((w, b))
    return params


def rnn_shop_mlp_forward(params, shops_embedding, distances_embedding,
                         ratings, comments, prices_embedding, group,
                         *, compute_dtype=jnp.bfloat16):
    """Pallas-backed equivalent of RNN_Shop_MLP.forward (ReLU after every layer).

    The torch.cat is fused into the kernel: features are passed separately and
    combined there, so no (B*S, D_in) intermediate ever touches HBM.
    """
    B, S = ratings.shape
    features = [                                   # same order as torch.cat
        shops_embedding.reshape(B * S, -1),
        distances_embedding.reshape(B * S, -1),
        ratings.reshape(B * S, 1),
        comments.reshape(B * S, 1),
        prices_embedding.reshape(B * S, -1),
        group.reshape(B * S, 1),
    ]
    y = fused_shop_mlp(features, params, compute_dtype=compute_dtype)
    return y.reshape(B, S, -1)


# --------------------------------- main ------------------------------------ #
if __name__ == "__main__":
    # Small synthetic config.
    B, S = 2, 8
    shops_dim, dist_dim, price_dim = 16, 8, 5
    d_in = shops_dim + dist_dim + 1 + 1 + price_dim + 1  # = 32
    config = {"shop_mlp_layers": [d_in, 64, 32]}

    key = jax.random.PRNGKey(0)
    key, k1, k2, k3, k4, k5, k6, kp = jax.random.split(key, 8)

    shops_embedding = jax.random.normal(k1, (B, S, shops_dim), jnp.float32)
    distances_embedding = jax.random.normal(k2, (B, S, dist_dim), jnp.float32)
    ratings = jax.random.normal(k3, (B, S), jnp.float32)
    comments = jax.random.normal(k4, (B, S), jnp.float32)
    prices_embedding = jax.random.normal(k5, (B, S, price_dim), jnp.float32)
    group = jax.random.normal(k6, (B, S), jnp.float32)

    params = init_shop_mlp_params(kp, config["shop_mlp_layers"])

    fwd = jax.jit(functools.partial(rnn_shop_mlp_forward, params))
    out = jax.block_until_ready(
        fwd(shops_embedding, distances_embedding, ratings, comments,
            prices_embedding, group))

    # Pure-JAX f32 reference mirroring the PyTorch module exactly
    # (concat -> [Linear -> ReLU] x L).  Tolerance covers the intentional
    # bf16-MXU / f32-accumulate dtype split used inside the kernel.
    def ref_forward():
        v = jnp.concatenate(
            [shops_embedding, distances_embedding,
             ratings[..., None], comments[..., None],
             prices_embedding, group[..., None]], axis=-1)
        h = v.reshape(B * S, -1)
        for w, b in params:
            h = jnp.maximum(h @ w + b, 0.0)
        return h.reshape(B, S, -1)

    ref = jax.block_until_ready(ref_forward())
    assert out.shape == (B, S, config["shop_mlp_layers"][-1]), out.shape
    assert jnp.allclose(out, ref, atol=2e-2, rtol=2e-2), (
        "mismatch vs f32 reference, max abs err = "
        f"{float(jnp.max(jnp.abs(out - ref)))}")

    print("KERNEL_OK")
</pallas_src>

<mosaic_0001>
module attributes {stable_mosaic.version = 11 : i64} {
  func.func @_fused_shop_mlp_kernel(%arg0: i32, %arg1: memref<8x16xf32, #tpu.memory_space<vmem>>, %arg2: memref<8x8xf32, #tpu.memory_space<vmem>>, %arg3: memref<8x1xf32, #tpu.memory_space<vmem>>, %arg4: memref<8x1xf32, #tpu.memory_space<vmem>>, %arg5: memref<8x5xf32, #tpu.memory_space<vmem>>, %arg6: memref<8x1xf32, #tpu.memory_space<vmem>>, %arg7: memref<16x64xbf16, #tpu.memory_space<vmem>>, %arg8: memref<8x64xbf16, #tpu.memory_space<vmem>>, %arg9: memref<1x64xf32, #tpu.memory_space<vmem>>, %arg10: memref<1x64xf32, #tpu.memory_space<vmem>>, %arg11: memref<5x64xf32, #tpu.memory_space<vmem>>, %arg12: memref<1x64xf32, #tpu.memory_space<vmem>>, %arg13: memref<1x64xf32, #tpu.memory_space<vmem>>, %arg14: memref<64x32xbf16, #tpu.memory_space<vmem>>, %arg15: memref<1x32xf32, #tpu.memory_space<vmem>>, %arg16: memref<8x32xf32, #tpu.memory_space<vmem>>) attributes {dimension_semantics = [#tpu.dimension_semantics<parallel>], iteration_bounds = array<i64: 2>, scalar_prefetch = 0 : i64, scratch_operands = 0 : i64, tpu.core_type = #tpu.core_type<tc>, window_params = [{transform_indices = @transform_0, window_bounds = array<i64: 8, 16>}, {transform_indices = @transform_1, window_bounds = array<i64: 8, 8>}, {transform_indices = @transform_2, window_bounds = array<i64: 8, 1>}, {transform_indices = @transform_3, window_bounds = array<i64: 8, 1>}, {transform_indices = @transform_4, window_bounds = array<i64: 8, 5>}, {transform_indices = @transform_5, window_bounds = array<i64: 8, 1>}, {pipeline_mode = #tpu.pipeline_mode<synchronous>, transform_indices = @transform_6, window_bounds = array<i64: 16, 64>}, {pipeline_mode = #tpu.pipeline_mode<synchronous>, transform_indices = @transform_7, window_bounds = array<i64: 8, 64>}, {pipeline_mode = #tpu.pipeline_mode<synchronous>, transform_indices = @transform_8, window_bounds = array<i64: 1, 64>}, {pipeline_mode = #tpu.pipeline_mode<synchronous>, transform_indices = @transform_9, window_bounds = array<i64: 1, 64>}, {pipeline_mode = #tpu.pipeline_mode<synchronous>, transform_indices = @transform_10, window_bounds = array<i64: 5, 64>}, {pipeline_mode = #tpu.pipeline_mode<synchronous>, transform_indices = @transform_11, window_bounds = array<i64: 1, 64>}, {pipeline_mode = #tpu.pipeline_mode<synchronous>, transform_indices = @transform_12, window_bounds = array<i64: 1, 64>}, {pipeline_mode = #tpu.pipeline_mode<synchronous>, transform_indices = @transform_13, window_bounds = array<i64: 64, 32>}, {pipeline_mode = #tpu.pipeline_mode<synchronous>, transform_indices = @transform_14, window_bounds = array<i64: 1, 32>}, {transform_indices = @transform_15, window_bounds = array<i64: 8, 32>}]} {
    %c0 = arith.constant 0 : index
    %c0_0 = arith.constant 0 : index
    %0 = vector.load %arg1[%c0, %c0_0] : memref<8x16xf32, #tpu.memory_space<vmem>>, vector<8x16xf32>
    %c0_1 = arith.constant 0 : index
    %c0_2 = arith.constant 0 : index
    %1 = vector.load %arg7[%c0_1, %c0_2] : memref<16x64xbf16, #tpu.memory_space<vmem>>, vector<16x64xbf16>
    %2 = arith.truncf %0 : vector<8x16xf32> to vector<8x16xbf16>
    %cst = arith.constant dense<0.000000e+00> : vector<8x64xf32>
    %3 = tpu.matmul %2, %1, %cst {dimension_numbers = #tpu.dot_dimension_numbers<[1], [0], [0], [1], [0, 0, 1, 1], [], []>} : vector<8x16xbf16>, vector<16x64xbf16>, vector<8x64xf32> -> vector<8x64xf32>
    %c0_3 = arith.constant 0 : index
    %c0_4 = arith.constant 0 : index
    %4 = vector.load %arg2[%c0_3, %c0_4] : memref<8x8xf32, #tpu.memory_space<vmem>>, vector<8x8xf32>
    %c0_5 = arith.constant 0 : index
    %c0_6 = arith.constant 0 : index
    %5 = vector.load %arg8[%c0_5, %c0_6] : memref<8x64xbf16, #tpu.memory_space<vmem>>, vector<8x64xbf16>
    %6 = arith.truncf %4 : vector<8x8xf32> to vector<8x8xbf16>
    %cst_7 = arith.constant dense<0.000000e+00> : vector<8x64xf32>
    %7 = tpu.matmul %6, %5, %cst_7 {dimension_numbers = #tpu.dot_dimension_numbers<[1], [0], [0], [1], [0, 0, 1, 1], [], []>} : vector<8x8xbf16>, vector<8x64xbf16>, vector<8x64xf32> -> vector<8x64xf32>
    %8 = arith.addf %3, %7 : vector<8x64xf32>
    %c0_8 = arith.constant 0 : index
    %c0_9 = arith.constant 0 : index
    %9 = vector.load %arg3[%c0_8, %c0_9] : memref<8x1xf32, #tpu.memory_space<vmem>>, vector<8x1xf32>
    %c0_10 = arith.constant 0 : index
    %c0_11 = arith.constant 0 : index
    %10 = vector.load %arg9[%c0_10, %c0_11] : memref<1x64xf32, #tpu.memory_space<vmem>>, vector<1x64xf32>
    %11 = vector.broadcast %9 : vector<8x1xf32> to vector<8x64xf32>
    %12 = vector.broadcast %10 : vector<1x64xf32> to vector<8x64xf32>
    %13 = arith.mulf %11, %12 : vector<8x64xf32>
    %14 = arith.addf %8, %13 : vector<8x64xf32>
    %c0_12 = arith.constant 0 : index
    %c0_13 = arith.constant 0 : index
    %15 = vector.load %arg4[%c0_12, %c0_13] : memref<8x1xf32, #tpu.memory_space<vmem>>, vector<8x1xf32>
    %c0_14 = arith.constant 0 : index
    %c0_15 = arith.constant 0 : index
    %16 = vector.load %arg10[%c0_14, %c0_15] : memref<1x64xf32, #tpu.memory_space<vmem>>, vector<1x64xf32>
    %17 = vector.broadcast %15 : vector<8x1xf32> to vector<8x64xf32>
    %18 = vector.broadcast %16 : vector<1x64xf32> to vector<8x64xf32>
    %19 = arith.mulf %17, %18 : vector<8x64xf32>
    %20 = arith.addf %14, %19 : vector<8x64xf32>
    %c0_16 = arith.constant 0 : index
    %c0_17 = arith.constant 0 : index
    %21 = vector.load %arg5[%c0_16, %c0_17] : memref<8x5xf32, #tpu.memory_space<vmem>>, vector<8x5xf32>
    %c0_18 = arith.constant 0 : index
    %c0_19 = arith.constant 0 : index
    %22 = vector.load %arg11[%c0_18, %c0_19] : memref<5x64xf32, #tpu.memory_space<vmem>>, vector<5x64xf32>
    %23 = vector.extract_strided_slice %21 {offsets = [0, 0], sizes = [8, 1], strides = [1, 1]} : vector<8x5xf32> to vector<8x1xf32>
    %24 = vector.extract_strided_slice %22 {offsets = [0, 0], sizes = [1, 64], strides = [1, 1]} : vector<5x64xf32> to vector<1x64xf32>
    %25 = vector.broadcast %23 : vector<8x1xf32> to vector<8x64xf32>
    %26 = vector.broadcast %24 : vector<1x64xf32> to vector<8x64xf32>
    %27 = arith.mulf %25, %26 : vector<8x64xf32>
    %28 = vector.extract_strided_slice %21 {offsets = [0, 1], sizes = [8, 1], strides = [1, 1]} : vector<8x5xf32> to vector<8x1xf32>
    %29 = vector.extract_strided_slice %22 {offsets = [1, 0], sizes = [1, 64], strides = [1, 1]} : vector<5x64xf32> to vector<1x64xf32>
    %30 = vector.broadcast %28 : vector<8x1xf32> to vector<8x64xf32>
    %31 = vector.broadcast %29 : vector<1x64xf32> to vector<8x64xf32>
    %32 = arith.mulf %30, %31 : vector<8x64xf32>
    %33 = arith.addf %27, %32 : vector<8x64xf32>
    %34 = vector.extract_strided_slice %21 {offsets = [0, 2], sizes = [8, 1], strides = [1, 1]} : vector<8x5xf32> to vector<8x1xf32>
    %35 = vector.extract_strided_slice %22 {offsets = [2, 0], sizes = [1, 64], strides = [1, 1]} : vector<5x64xf32> to vector<1x64xf32>
    %36 = vector.broadcast %34 : vector<8x1xf32> to vector<8x64xf32>
    %37 = vector.broadcast %35 : vector<1x64xf32> to vector<8x64xf32>
    %38 = arith.mulf %36, %37 : vector<8x64xf32>
    %39 = arith.addf %33, %38 : vector<8x64xf32>
    %40 = vector.extract_strided_slice %21 {offsets = [0, 3], sizes = [8, 1], strides = [1, 1]} : vector<8x5xf32> to vector<8x1xf32>
    %41 = vector.extract_strided_slice %22 {offsets = [3, 0], sizes = [1, 64], strides = [1, 1]} : vector<5x64xf32> to vector<1x64xf32>
    %42 = vector.broadcast %40 : vector<8x1xf32> to vector<8x64xf32>
    %43 = vector.broadcast %41 : vector<1x64xf32> to vector<8x64xf32>
    %44 = arith.mulf %42, %43 : vector<8x64xf32>
    %45 = arith.addf %39, %44 : vector<8x64xf32>
    %46 = vector.extract_strided_slice %21 {offsets = [0, 4], sizes = [8, 1], strides = [1, 1]} : vector<8x5xf32> to vector<8x1xf32>
    %47 = vector.extract_strided_slice %22 {offsets = [4, 0], sizes = [1, 64], strides = [1, 1]} : vector<5x64xf32> to vector<1x64xf32>
    %48 = vector.broadcast %46 : vector<8x1xf32> to vector<8x64xf32>
    %49 = vector.broadcast %47 : vector<1x64xf32> to vector<8x64xf32>
    %50 = arith.mulf %48, %49 : vector<8x64xf32>
    %51 = arith.addf %45, %50 : vector<8x64xf32>
    %52 = arith.addf %20, %51 : vector<8x64xf32>
    %c0_20 = arith.constant 0 : index
    %c0_21 = arith.constant 0 : index
    %53 = vector.load %arg6[%c0_20, %c0_21] : memref<8x1xf32, #tpu.memory_space<vmem>>, vector<8x1xf32>
    %c0_22 = arith.constant 0 : index
    %c0_23 = arith.constant 0 : index
    %54 = vector.load %arg12[%c0_22, %c0_23] : memref<1x64xf32, #tpu.memory_space<vmem>>, vector<1x64xf32>
    %55 = vector.broadcast %53 : vector<8x1xf32> to vector<8x64xf32>
    %56 = vector.broadcast %54 : vector<1x64xf32> to vector<8x64xf32>
    %57 = arith.mulf %55, %56 : vector<8x64xf32>
    %58 = arith.addf %52, %57 : vector<8x64xf32>
    %c0_24 = arith.constant 0 : index
    %c0_25 = arith.constant 0 : index
    %59 = vector.load %arg13[%c0_24, %c0_25] : memref<1x64xf32, #tpu.memory_space<vmem>>, vector<1x64xf32>
    %60 = vector.broadcast %59 : vector<1x64xf32> to vector<8x64xf32>
    %61 = arith.addf %58, %60 : vector<8x64xf32>
    %cst_26 = arith.constant 0.000000e+00 : f32
    %62 = vector.broadcast %cst_26 : f32 to vector<8x64xf32>
    %63 = arith.maximumf %61, %62 : vector<8x64xf32>
    %c0_27 = arith.constant 0 : index
    %c0_28 = arith.constant 0 : index
    %64 = vector.load %arg14[%c0_27, %c0_28] : memref<64x32xbf16, #tpu.memory_space<vmem>>, vector<64x32xbf16>
    %c0_29 = arith.constant 0 : index
    %c0_30 = arith.constant 0 : index
    %65 = vector.load %arg15[%c0_29, %c0_30] : memref<1x32xf32, #tpu.memory_space<vmem>>, vector<1x32xf32>
    %66 = arith.truncf %63 : vector<8x64xf32> to vector<8x64xbf16>
    %cst_31 = arith.constant dense<0.000000e+00> : vector<8x32xf32>
    %67 = tpu.matmul %66, %64, %cst_31 {dimension_numbers = #tpu.dot_dimension_numbers<[1], [0], [0], [1], [0, 0, 1, 1], [], []>} : vector<8x64xbf16>, vector<64x32xbf16>, vector<8x32xf32> -> vector<8x32xf32>
    %68 = vector.broadcast %65 : vector<1x32xf32> to vector<8x32xf32>
    %69 = arith.addf %67, %68 : vector<8x32xf32>
    %cst_32 = arith.constant 0.000000e+00 : f32
    %70 = vector.broadcast %cst_32 : f32 to vector<8x32xf32>
    %71 = arith.maximumf %69, %70 : vector<8x32xf32>
    %c0_33 = arith.constant 0 : index
    %c0_34 = arith.constant 0 : index
    %72 = vector.load %arg16[%c0_33, %c0_34] : memref<8x32xf32, #tpu.memory_space<vmem>>, vector<8x32xf32>
    tpu.vector_store %arg16[%c0_33, %c0_34], %71 {strides = array<i32>} : memref<8x32xf32, #tpu.memory_space<vmem>>, vector<8x32xf32>,
    return
  }
  func.func @transform_0(%arg0: i32) -> (i32, i32) {
    %c0_i32 = arith.constant 0 : i32
    %c0_i32_0 = arith.constant 0 : i32
    return %arg0, %c0_i32 : i32, i32
  }
  func.func @transform_1(%arg0: i32) -> (i32, i32) {
    %c0_i32 = arith.constant 0 : i32
    %c0_i32_0 = arith.constant 0 : i32
    return %arg0, %c0_i32 : i32, i32
  }
  func.func @transform_2(%arg0: i32) -> (i32, i32) {
    %c0_i32 = arith.constant 0 : i32
    %c0_i32_0 = arith.constant 0 : i32
    return %arg0, %c0_i32 : i32, i32
  }
  func.func @transform_3(%arg0: i32) -> (i32, i32) {
    %c0_i32 = arith.constant 0 : i32
    %c0_i32_0 = arith.constant 0 : i32
    return %arg0, %c0_i32 : i32, i32
  }
  func.func @transform_4(%arg0: i32) -> (i32, i32) {
    %c0_i32 = arith.constant 0 : i32
    %c0_i32_0 = arith.constant 0 : i32
    return %arg0, %c0_i32 : i32, i32
  }
  func.func @transform_5(%arg0: i32) -> (i32, i32) {
    %c0_i32 = arith.constant 0 : i32
    %c0_i32_0 = arith.constant 0 : i32
    return %arg0, %c0_i32 : i32, i32
  }
  func.func @transform_6(%arg0: i32) -> (i32, i32) {
    %c0_i32 = arith.constant 0 : i32
    %c0_i32_0 = arith.constant 0 : i32
    %c0_i32_1 = arith.constant 0 : i32
    return %c0_i32, %c0_i32_0 : i32, i32
  }
  func.func @transform_7(%arg0: i32) -> (i32, i32) {
    %c0_i32 = arith.constant 0 : i32
    %c0_i32_0 = arith.constant 0 : i32
    %c0_i32_1 = arith.constant 0 : i32
    return %c0_i32, %c0_i32_0 : i32, i32
  }
  func.func @transform_8(%arg0: i32) -> (i32, i32) {
    %c0_i32 = arith.constant 0 : i32
    %c0_i32_0 = arith.constant 0 : i32
    %c0_i32_1 = arith.constant 0 : i32
    return %c0_i32, %c0_i32_0 : i32, i32
  }
  func.func @transform_9(%arg0: i32) -> (i32, i32) {
    %c0_i32 = arith.constant 0 : i32
    %c0_i32_0 = arith.constant 0 : i32
    %c0_i32_1 = arith.constant 0 : i32
    return %c0_i32, %c0_i32_0 : i32, i32
  }
  func.func @transform_10(%arg0: i32) -> (i32, i32) {
    %c0_i32 = arith.constant 0 : i32
    %c0_i32_0 = arith.constant 0 : i32
    %c0_i32_1 = arith.constant 0 : i32
    return %c0_i32, %c0_i32_0 : i32, i32
  }
  func.func @transform_11(%arg0: i32) -> (i32, i32) {
    %c0_i32 = arith.constant 0 : i32
    %c0_i32_0 = arith.constant 0 : i32
    %c0_i32_1 = arith.constant 0 : i32
    return %c0_i32, %c0_i32_0 : i32, i32
  }
  func.func @transform_12(%arg0: i32) -> (i32, i32) {
    %c0_i32 = arith.constant 0 : i32
    %c0_i32_0 = arith.constant 0 : i32
    %c0_i32_1 = arith.constant 0 : i32
    return %c0_i32, %c0_i32_0 : i32, i32
  }
  func.func @transform_13(%arg0: i32) -> (i32, i32) {
    %c0_i32 = arith.constant 0 : i32
    %c0_i32_0 = arith.constant 0 : i32
    %c0_i32_1 = arith.constant 0 : i32
    return %c0_i32, %c0_i32_0 : i32, i32
  }
  func.func @transform_14(%arg0: i32) -> (i32, i32) {
    %c0_i32 = arith.constant 0 : i32
    %c0_i32_0 = arith.constant 0 : i32
    %c0_i32_1 = arith.constant 0 : i32
    return %c0_i32, %c0_i32_0 : i32, i32
  }
  func.func @transform_15(%arg0: i32) -> (i32, i32) {
    %c0_i32 = arith.constant 0 : i32
    %c0_i32_0 = arith.constant 0 : i32
    return %arg0, %c0_i32 : i32, i32
  }
}

</mosaic_0001>

<bundles_post_ra>
// kernel: rnn_shop_mlp_forward.1
= control target key start
LH: loop header
LB: loop body
LE: loop exit
PB: predicated region body
PF: predicated region fallthrough
CT: control target
= control target key end

     0   :  { %s1442_s0 = inlined_call_operand.vmem [shape: f32[16,16], index: 0, kind: input, shape index: {}]   ;;  %s1443_s1 = inlined_call_operand.vmem [shape: f32[16,8], index: 1, kind: input, shape index: {}]   ;;  %s1444_s2 = inlined_call_operand.vmem [shape: f32[16,1], index: 2, kind: input, shape index: {}]   ;;  %s1445_s3 = inlined_call_operand.vmem [shape: f32[16,1], index: 3, kind: input, shape index: {}]   ;;  %s1446_s4 = inlined_call_operand.vmem [shape: f32[16,5], index: 4, kind: input, shape index: {}]   ;;  %s1447_s5 = inlined_call_operand.vmem [shape: f32[16,1], index: 5, kind: input, shape index: {}]   ;;  %s1448_s6 = inlined_call_operand.vmem [shape: bf16[16,64], index: 6, kind: input, shape index: {}]   ;;  %s1449_s7 = inlined_call_operand.vmem [shape: bf16[8,64], index: 7, kind: input, shape index: {}]   ;;  %s1450_s8 = inlined_call_operand.vmem [shape: f32[1,64], index: 8, kind: input, shape index: {}]   ;;  %s1451_s9 = inlined_call_operand.vmem [shape: f32[1,64], index: 9, kind: input, shape index: {}]   ;;  %s1452_s10 = inlined_call_operand.vmem [shape: f32[5,64], index: 10, kind: input, shape index: {}]   ;;  %s1453_s11 = inlined_call_operand.vmem [shape: f32[1,64], index: 11, kind: input, shape index: {}]   ;;  %s1454_s12 = inlined_call_operand.vmem [shape: f32[1,64], index: 12, kind: input, shape index: {}]   ;;  %s1455_s13 = inlined_call_operand.vmem [shape: bf16[64,32], index: 13, kind: input, shape index: {}]   ;;  %s1456_s14 = inlined_call_operand.vmem [shape: f32[1,32], index: 14, kind: input, shape index: {}]   ;;  %s1457_s15 = inlined_call_operand.hbm [shape: f32[16,32], index: 15, kind: output, shape index: {}]  }
   0x1   :  { %1464 = sst [smem:[#allocation11_spill]] %s1449_s7 }
   0x2   :  { %20 = vsyncpa [#allocation3], 0 }
   0x3   :  { %22 = vsyncpa [#allocation3 + $0x1], 0  ;;  %s1280_s18 = smov 0   ;;  %s1282_s19 = smov 0  }
   0x4   :  { %s1284_s20 = smov 0   ;;  %s1286_s21 = smov 0  }
   0x5 LB: > { %1465 = sst [smem:[#allocation5_spill]] %s1178_s18  ;;  %s1301_s22 = sadd.s32 4294967295, %s1190_s21   ;;  %s1190_s21 = sphi %s1286_s21, %s1477_s21   ;;  %s1186_s20 = sphi %s1284_s20, %s1479_s20   ;;  %s1182_s19 = sphi %s1282_s19, %s1481_s19   ;;  %s1178_s18 = sphi %s1280_s18, %s1480_s18  }
   0x6   : > { %1466 = sst [smem:[#allocation6_spill]] %s1186_s20  ;;  %s1008_s23 = sadd.s32 4294967294, %s1190_s21  }
   0x7   : > { %1467 = sst [smem:[#allocation7_spill]] %s1190_s21  ;;  %s1305_s24 = sadd.s32 1, %s1190_s21  }
   0x8   : > { %1468 = sst [smem:[#allocation8_spill]] %s1305_s24  ;;  %s380_s25 = sadd.s32 1, %s1186_s20 }
   0x9   : > { %s377_s26 = ssub.s32 %s1190_s21, %s1305_s24  ;;  %p390_p0 = scmp.ne.s32.totalorder %s1186_s20, %s1182_s19 }
   0xa   : > { %p378_p1 = scmp.eq.s32.totalorder %s377_s26, 0  ;;  %p391_p2 = scmp.eq.s32.totalorder %s1301_s22, 1 }
   0xb   : > { %p396_p3 = scmp.ne.s32.totalorder %s1182_s19, %s1178_s18  ;;  %p397_p4 = scmp.eq.s32.totalorder %s1008_s23, 1 }
   0xc   : > { %s1316_s27 = scalar_select %p378_p1, %s1186_s20, %s380_s25  }
   0xd   : > { %p1318_p5 = por %p391_p2, %p390_p0  ;;  %p1322_p6 = por %p397_p4, %p396_p3 }
   0xe   : > { %1469 = sst [smem:[#allocation9_spill]] %s1316_s27  ;;  %p1011_p7 = scmp.ge.s32.totalorder %s1190_s21, 1 }
   0xf   : > { %s1471_s29 = scalar_select %p1322_p6, 1, 0 }
  0x10   : > { %p484_p8 = scmp.lt.s32.totalorder %s1190_s21, 3 }
  0x11   : > { %1472 = sst [smem:[#allocation10_spill]] %s1471_s29 }
  0x12   : > { %p485_p9 = pnand %p1011_p7, %p484_p8 }
  0x13   : > { %s1473_s7 = sld [smem:[#allocation11_spill]] (!%p485_p9)  ;;  %vm587_vm0 = vcmask (!%p485_p9), 1043456   ;;  %p551_p10 = scmp.lt.s32.totalorder (!%p485_p9), %s1301_s22, 1  ;;  %v1192_v1 = vmov (!%p485_p9), 0.0   ;;  %vm1193_vm1 = vmmov (!%p485_p9), 0   ;;  %v1194_v3 = vmov (!%p485_p9), 2  }
  0x14   : > { %488 = sbr.rel (%p485_p9) target bundleno = 500 (0x1f4), region = 80  ;;  %1045 = vmatprep.subr.bf16.mxu1 (!%p485_p9), %v1192_v1  ;;  %1047 = vmatprep.mubr.msk.bf16.mxu1 (!%p485_p9), %vm1193_vm1, %v1192_v1  ;;  %v1195_v4 = vmov (!%p485_p9), 0   ;;  %vm583_vm2 = vcmask (!%p485_p9), 64512   ;;  %v1123_v6 = vld [vmem:[%s1448_s6] sm:$0xff] (!%p485_p9)   ;;  %v1196_v11 = vmov (!%p485_p9), 1   ;;  %vm637_vm3 = vcmask (!%p485_p9), 130048  }
  0x15   : > { %1057 = vmatprep.subr.bf16.mxu0 (!%p485_p9), %v1192_v1  ;;  %1117 = vset.pattern.permute.xlu1 (!%p485_p9), %v1194_v3  ;;  %v1197_v14 = vmov (!%p485_p9), 3   ;;  %v1198_v15 = vmov (!%p485_p9), 4   ;;  %v1124_v17 = vld [vmem:[%s1455_s13] sm:$0xff] (!%p485_p9)   ;;  %v1125_v18 = vld [vmem:[%s1455_s13 + $0x8] sm:$0xff] (!%p485_p9)   ;;  %v1126_v19 = vld [vmem:[%s1455_s13 + $0x10] sm:$0xff] (!%p485_p9)   ;;  %v718_v21 = vlaneseq (!%p485_p9)  ;;  %vm828_vm4 = vcmask (!%p485_p9), 523264  }
  0x16   : > { %1115 = vset.pattern.permute.xlu0 (!%p485_p9), %v1195_v4  ;;  %1065 = vmatprep.mubr.msk.bf16.mxu0 (!%p485_p9), %vm1193_vm1, %v1192_v1  ;;  %v1127_v20 = vld [vmem:[%s1455_s13 + $0x18] sm:$0xff] (!%p485_p9)   ;;  %v712_v27 = vld [vmem:[%s1452_s10] sm:$0x1f] (!%p485_p9)  ;;  %vm873_vm5 = vcmask (!%p485_p9), 261120  }
  0x17   : > { %1058 = vmatpush3.bf16.msra.mxu0 (!%p485_p9), %v1124_v17  ;;  %v719_v22 = vshrl.u32 (!%p485_p9), %v718_v21, 7  ;;  %v1022_v46 = vld [vmem:[%s1450_s8] ss:$0 sm:$0xff] (!%p485_p9) }
  0x18   : > { %1059 = vmatprep.subr.bf16.mxu0 (!%p485_p9), %v1192_v1  ;;  %v1023_v51 = vld [vmem:[%s1451_s9] ss:$0 sm:$0xff] (!%p485_p9) }
  0x19   : > { %v581_v0 = vld [vmem:[%s1473_s7] sm:$0xf] (!%p485_p9)  ;;  %v720_v25 = vsub.s32 (!%p485_p9), 0, %v719_v22  ;;  %v729_v26 = vsub.s32 (!%p485_p9), 1, %v719_v22  ;;  %v739_v28 = vsub.s32 (!%p485_p9), 2, %v719_v22  ;;  %v749_v36 = vsub.s32 (!%p485_p9), 3, %v719_v22 }
  0x1a   : > { %v589_v2 = vsel (!%p485_p9), %vm587_vm0, %v581_v0, 0  ;;  %v759_v42 = vsub.s32 (!%p485_p9), 4, %v719_v22  ;;  %v1024_v61 = vld [vmem:[%s1453_s11] ss:$0 sm:$0xff] (!%p485_p9) }
  0x1b   : > { %1046 = vmatpush3.bf16.msra.mxu1 %v589_v2  ;;  %s552_s17 = scalar_select %p551_p10, %s1301_s22, 1  ;;  %1060 = vmatpush3.bf16.msra.mxu0 %v1125_v18  ;;  %v721_v29 = vrot.slane %v712_v27, %v720_v25  ;;  %v730_v30 = vrot.slane %v712_v27, %v729_v26  ;;  %v740_v33 = vrot.slane %v712_v27, %v739_v28 }
  0x1c   : > { %1051 = vmatprep.subr.bf16.mxu1 %v1192_v1  ;;  %1061 = vmatprep.subr.bf16.mxu0 %v1192_v1  ;;  %v750_v41 = vrot.slane %v712_v27, %v749_v36  ;;  %v760_v49 = vrot.slane %v712_v27, %v759_v42 }
  0x1d   : > { %s1334_s23 = sshll.u32 %s552_s17, 3  ;;  %s1199_s17 = smov [#allocation2]  }
  0x1e   : > { %s558_s30 = scalar_lea.vmem %s1443_s1, %s1334_s23  ;;  %s570_s20 = scalar_lea.vmem %s1446_s4, %s1334_s23 }
  0x1f   : > { %v580_v5 = vld [vmem:[%s558_s30] sm:$0xff]  ;;  %s554_s18 = scalar_lea.vmem %s1442_s0, %s1334_s23  ;;  %s562_s26 = scalar_lea.vmem %s1444_s2, %s1334_s23  ;;  %1062 = vmatpush3.bf16.msra.mxu0 %v1126_v19 }
  0x20   : > { %v582_v7 = vpack.c.bf16 %v580_v5, %v580_v5  ;;  %v711_v8 = vld [vmem:[%s570_s20] sm:$0xff]  ;;  %s566_s21 = scalar_lea.vmem %s1445_s3, %s1334_s23  ;;  %s574_s27 = scalar_lea.vmem %s1447_s5, %s1334_s23  ;;  %1063 = vmatprep.subr.bf16.mxu0 %v1192_v1 }
  0x21   : > { %734 = vperm.xlu1 %1117, %v711_v8   ;;  %715 = vperm.xlu0 %1115, %v711_v8   ;;  %v576_v9 = vld [vmem:[%s554_s18] sm:$0xff]  ;;  %s1132_s25 = sshll.u32 %s1199_s17, 4  ;;  %s1133_s25 = int_to_ptr.vmem [resolvable:$false] %s1132_s25 }
  0x22   : > { %1048 = vmatmul.mubr.msk.bf16.vlgmr.msra.gmra.mrb[0].mxu1 %vm583_vm2, %v582_v7  ;;  %v681_v10 = vld [vmem:[%s562_s26] sm:$0xff]  ;;  %v579_v12 = vpack.c.bf16 %v576_v9, %v576_v9  ;;  %s548_s26 = sand.u32 1, %s1182_s19  }
  0x23   : > { %1052 = vmatpush3.bf16.msra.mxu1 %v1123_v6  ;;  %1053 = vmatprep.mubr.msk.bf16.mxu1 %vm1193_vm1, %v1192_v1  ;;  %v696_v13 = vld [vmem:[%s566_s21] sm:$0xff]  ;;  %s1012_s23 = sshll.u32 %s548_s26, 3  ;;  %s1033_s21 = sshll.u32 %s1301_s22, 7 }
  0x24   : > { %v764_v16 = vld [vmem:[%s574_s27] sm:$0xff]  ;;  %1064 = vmatpush3.bf16.msra.mxu0 %v1127_v20  ;;  %s550_s18 = scalar_lea.vmem [#allocation2], %s1012_s23  ;;  %s1400_s30 = scalar_lea.hbm %s1457_s15, %s1033_s21 }
  0x25   : > { %1118 = vset.pattern.permute.xlu1 %v1195_v4  ;;  %1116 = vset.pattern.permute.xlu0 %v1196_v11  ;;  %v1025_v5 = vld [vmem:[%s1454_s12] ss:$0 sm:$0xff]  ;;  %s889_s24 = sshll.u32 %s550_s18, 4  ;;  %s876_s22 = scalar_lea.sflag [#allocation3], %s548_s26  ;;  %s1402_s24 = int_to_ptr.vmem [resolvable:$true] %s889_s24 }
  0x26   : > { %685 = vperm.xlu1 %1118, %v681_v10   ;;  %724 = vperm.xlu0 %1116, %v711_v8   ;;  %v1026_v10 = vld [vmem:[%s1456_s14] ss:$0 sm:$0xff]  ;;  %s1128_s16 = scalar_lea.vmem %s1402_s24, 128  ;;  %s1134_s23 = scalar_lea.vmem %s1133_s25, 256 }
  0x27   : > { %p1129_p11 = scmp.ne.s32.totalorder %s1402_s24, %s1128_s16  ;;  %p1135_p0 = scmp.lt.s32.totalorder %s1402_s24, %s1133_s25 }
  0x28   : > { %p1136_p1 = scmp.lt.s32.totalorder %s1134_s23, %s1128_s16 }
  0x29   : > { %p1130_p12 = pnand %p1129_p11, %p1318_p5 }
  0x2a   : > { %1054 = vmatmul.mubr.msk.bf16.vlgmr.msra.gmra.mrb[4].mxu1 %vm637_vm3, %v579_v12  ;;  %1119 = vset.pattern.permute.xlu1 %v1197_v14  ;;  %p1137_p2 = por %p1136_p1, %p1135_p0 }
  0x2b   : > { %744 = vperm.xlu1 %1119, %v711_v8   ;;  %1120 = vset.pattern.permute.xlu0 %v1195_v4  ;;  %p1131_p13 = pneg %p1130_p12 }
  0x2c   : > { %700 = vperm.xlu0 %1120, %v696_v13  }
  0x2d   : > { %p1138_p3 = pnand %p1137_p2, %p1131_p13 }
  0x2f   : > { %1121 = vset.pattern.permute.xlu1 %v1198_v15 }
  0x30   : > { %754 = vperm.xlu1 %1121, %v711_v8  }
  0x34   : > { %1122 = vset.pattern.permute.xlu1 %v1195_v4 }
  0x35   : > { %768 = vperm.xlu1 %1122, %v764_v16  }
  0xa0   : > { %v735_v23 = vpop.permute.xlu1 %734  ;;  %v716_v24 = vpop.permute.xlu0 %715 }
  0xa1   : > { %v722_v34 = vmul.f32 %v721_v29, %v716_v24  ;;  %v741_v39 = vmul.f32 %v740_v33, %v735_v23 }
  0xa5   : > { %v686_v31 = vpop.permute.xlu1 %685  ;;  %v725_v32 = vpop.permute.xlu0 %724 }
  0xa6   : > { %v731_v35 = vmul.f32 %v730_v30, %v725_v32  ;;  %v694_v53 = vmul.f32 %v1022_v46, %v686_v31 }
  0xa8   : > { %v732_v40 = vadd.f32 %v731_v35, %v722_v34 }
  0xaa   : > { %v745_v37 = vpop.permute.xlu1 %744  ;;  %v742_v47 = vadd.f32 %v741_v39, %v732_v40 }
  0xab   : > { %v751_v48 = vmul.f32 %v750_v41, %v745_v37  ;;  %v701_v52 = vpop.permute.xlu0 %700 }
  0xac   : > { %v709_v59 = vmul.f32 %v1023_v51, %v701_v52 }
  0xad   : > { %v752_v55 = vadd.f32 %v751_v48, %v742_v47 }
  0xaf   : > { %v755_v50 = vpop.permute.xlu1 %754 }
  0xb0   : > { %v761_v56 = vmul.f32 %v760_v49, %v755_v50 }
  0xb2   : > { %v762_v1 = vadd.f32 %v761_v56, %v752_v55 }
  0xb4   : > { %v769_v62 = vpop.permute.xlu1 %768 }
  0xb5   : > { %v777_v3 = vmul.f32 %v1024_v61, %v769_v62 }
  0xf5   : > { %v625_v38 = vpop.f32.mrb[0].mxu1 }
  0xf6   : > { %v1049_v43 = vpop.f32.mrb[1].mxu1 }
  0xf7   : > { %v628_v44 = vpop.f32.mrb[2].mxu1 }
  0xf8   : > { %v1050_v45 = vpop.f32.mrb[3].mxu1 }
  0xfd   : > { %v675_v54 = vpop.f32.mrb[4].mxu1 }
  0xfe   : > { %v676_v57 = vadd.f32 %v675_v54, %v625_v38  ;;  %v1055_v58 = vpop.f32.mrb[5].mxu1 }
  0xff   : > { %v678_v60 = vpop.f32.mrb[6].mxu1 }
 0x100   : > { %v695_v63 = vadd.f32 %v694_v53, %v676_v57  ;;  %v1056_v0 = vpop.f32.mrb[7].mxu1 }
 0x102   : > { %v710_v2 = vadd.f32 %v709_v59, %v695_v63 }
 0x104   : > { %v763_v4 = vadd.f32 %v762_v1, %v710_v2 }
 0x106   : > { %v778_v6 = vadd.f32 %v777_v3, %v763_v4 }
 0x108   : > { %v786_v7 = vadd.f32 %v1025_v5, %v778_v6 }
 0x10a   : > { %v787_v8 = vmax.f32 %v786_v7, 0.0 }
 0x10c   : > { %v797_v9 = vpack.c.bf16 %v787_v8, %v787_v8 }
 0x10e   : > { %1066 = vmatmul.mubr.msk.bf16.vlgmr.msra.gmra.mrb[0].mxu0 %vm828_vm4, %v797_v9 }
 0x1e1   : > { %v866_v11 = vpop.f32.mrb[0].mxu0 }
 0x1e2   : > { %v867_v12 = vadd.f32 %v1026_v10, %v866_v11  ;;  %v1067_v13 = vpop.f32.mrb[1].mxu0 }
 0x1e3   : > { %v869_v14 = vpop.f32.mrb[2].mxu0 }
 0x1e4   : > { %v872_v15 = vmax.f32 %v867_v12, 0.0  ;;  %v1068_v16 = vpop.f32.mrb[3].mxu0 }
 0x1e6   : > { %874 = vst.msk [vmem:[%s550_s18] sm:$0xff] %vm873_vm5, %v872_v15 }
 0x1e7   : > { %1141 = shalt.err (!%p1138_p3)
}
 0x1e8   : > { %s1142_s26 = scalar_lea.hbm %s1400_s30, 128  ;;  %s1146_s21 = scalar_lea.hbm %s1457_s15, 256 }
 0x1e9   : > { %p1143_p4 = scmp.ne.s32.totalorder %s1400_s30, %s1142_s26  ;;  %p1147_p9 = scmp.lt.u32.totalorder %s1400_s30, %s1457_s15 }
 0x1ea   : > { %p1148_p10 = scmp.lt.u32.totalorder %s1146_s21, %s1142_s26  ;;  %p1150_p12 = scmp.lt.u32.totalorder %s1142_s26, %s1400_s30 }
 0x1eb   : > { %p1144_p7 = pnand %p1143_p4, %p1318_p5 }
 0x1ec   : > { %p1149_p11 = por %p1148_p10, %p1147_p9 }
 0x1ed   : > { %p1145_p8 = pneg %p1144_p7 }
 0x1ee   : > { %p1151_p13 = por %p1150_p12, %p1149_p11 }
 0x1f0   : > { %p1152_p0 = pnand %p1151_p13, %p1145_p8 }
 0x1f2   : > { %1155 = shalt.err (!%p1152_p0)
}
 0x1f3   : > { %1069 = dma.vmem_to_hbm [thread:$0]  (%p1318_p5), %s1402_s24, 128, %s1400_s30, %s876_s22  }
 0x1f4 PF: > { %s1474_s29 = sld [smem:[#allocation7_spill]]  ;;  %s1475_s16 = sld [smem:[#allocation5_spill]] }
 0x1fa   : > { %p1075_p1 = scmp.ge.s32.totalorder %s1474_s29, 2  ;;  %s901_s25 = sand.u32 1, %s1475_s16  }
 0x1fb   : > { %s902_s23 = scalar_lea.sflag [#allocation3], %s901_s25 }
 0x1fc   : > { %p1072_p2 = pnand %p1075_p1, %p1322_p6 }
 0x1fe   : > { %1173 = dma.done.wait (!%p1072_p2), %s902_s23, 128  }
 0x1ff   : > { %1175 = vsyncadd (!%p1072_p2), %s902_s23, 4294967168  ;;  %s1477_s21 = sld [smem:[#allocation8_spill]]  ;;  %s1478_s26 = sld [smem:[#allocation6_spill]] }
 0x200   : > { %s1479_s20 = sld [smem:[#allocation9_spill]]  ;;  %s1480_s18 = smov %s1182_s19 }
 0x205   : > { %p25_p3 = scmp.ge.s32.totalorder %s1477_s21, 4   ;;  %s1481_s19 = smov %s1478_s26 }
 0x207   :  { %27 = sbr.rel (!%p25_p3) target bundleno = 5 (0x5), region = 130 }
 0x20e   :  { %907 = vsyncpa [#allocation3], 1 }
 0x20f   :  { %909 = vsyncpa [#allocation3 + $0x1], 1 }

</bundles_post_ra>
